<compile_context>
chip_gen: v7x
topology: tpu7x:2x2x1
jax: 0.10.0
libtpu: 0.0.40
codegen_flags: <defaults>
</compile_context>

<pallas_src>
import jax
import jax.numpy as jnp
from jax.experimental import pallas as pl
from jax.experimental.pallas import tpu as pltpu


def _round_up(x, m):
    return ((x + m - 1) // m) * m


def _frozen_bn_kernel(scale_ref, shift_ref, x_ref, o_ref):
    """o = x * scale + shift; scale/shift are per-row (row_tile, 1) columns."""
    x = x_ref[...].astype(jnp.float32)
    o_ref[...] = (x * scale_ref[...] + shift_ref[...]).astype(o_ref.dtype)


def frozen_batch_norm_2d(x, weight, bias, running_mean, running_var, eps=1e-5,
                         *, target_tile_bytes=8 << 20):
    """x: (N, C, H, W); per-channel buffers: (C,). Matches the PyTorch forward."""
    if x.ndim != 4:
        raise ValueError("expected 4D input (got %dD input)" % x.ndim)
    N, C, H, W = x.shape
    R, HW = N * C, H * W
    itemsize = jnp.dtype(x.dtype).itemsize
    sub = max(8, 32 // itemsize)          # sublane packing: 8 f32, 16 bf16

    # Fold the 4 buffers into an affine pair (C-length math in the wrapper: free).
    scale_c = weight.astype(jnp.float32) * jax.lax.rsqrt(
        running_var.astype(jnp.float32) + jnp.float32(eps))
    shift_c = bias.astype(jnp.float32) - running_mean.astype(jnp.float32) * scale_c

    # ---- tile selection -------------------------------------------------
    HW_lane = _round_up(HW, 128)          # lane-padded VMEM footprint per row
    if HW_lane * itemsize * sub <= target_tile_bytes:
        # Whole spatial extent per block (lane dim == HW is always legal, even
        # when HW % 128 != 0); pick rows to fill the x-tile byte budget, capped
        # so the pipeline (x + out double-buffered + lane-padded param columns)
        # stays within ~32 MiB of VMEM.
        col_tile = HW
        row_tile = (target_tile_bytes // (HW_lane * itemsize)) // sub * sub
        bytes_per_row = 4 * HW_lane * itemsize + 4 * 128 * 4
        row_vmem_cap = ((32 << 20) // bytes_per_row) // sub * sub
        row_tile = max(sub, min(row_tile, row_vmem_cap))
    else:
        # Very wide rows: tile the lane axis too (multiple of 128).
        row_tile = sub
        col_tile = (target_tile_bytes // (sub * itemsize)) // 128 * 128
        col_tile = max(128, min(col_tile, HW_lane))
        if col_tile >= HW:
            col_tile = HW

    n_col_blocks = pl.cdiv(HW, col_tile)
    if n_col_blocks == 1 and R >= 4 * sub:
        # Keep a few row blocks so the pipeline overlaps and both TensorCores
        # (v7x) get work; no-op once R is large relative to the tile budget.
        row_tile = min(row_tile, max(sub, _round_up(pl.cdiv(R, 4), sub)))
    row_tile = min(row_tile, R)           # full-dim block when R is small
    grid = (pl.cdiv(R, row_tile), n_col_blocks)

    # ---- layout glue (no padding, no trailing slice) --------------------
    x2 = x.reshape(R, HW)
    scale_col = jnp.tile(scale_c, N).reshape(R, 1)
    shift_col = jnp.tile(shift_c, N).reshape(R, 1)

    x_spec = pl.BlockSpec((row_tile, col_tile), lambda i, j: (i, j))
    par_spec = pl.BlockSpec((row_tile, 1), lambda i, j: (i, 0))

    # VMEM accounting: x + out double-buffered, plus two lane-padded f32 param
    # columns (also double-buffered). Clamp to a v7x-safe scoped limit.
    row_vmem = _round_up(row_tile, sub)
    col_vmem = _round_up(col_tile, 128)
    pipeline_bytes = 4 * row_vmem * col_vmem * itemsize + 4 * row_vmem * 128 * 4
    vmem_limit = int(min(max(pipeline_bytes + (2 << 20), 32 << 20), 48 << 20))

    out2 = pl.pallas_call(
        _frozen_bn_kernel,
        out_shape=jax.ShapeDtypeStruct((R, HW), x.dtype),
        grid=grid,
        in_specs=[par_spec, par_spec, x_spec],
        out_specs=x_spec,
        compiler_params=pltpu.CompilerParams(
            dimension_semantics=("parallel", "parallel"),
            vmem_limit_bytes=vmem_limit),
    )(scale_col, shift_col, x2)

    return out2.reshape(N, C, H, W)


if __name__ == "__main__":
    key = jax.random.PRNGKey(0)
    eps = 1e-5

    def ref_fn(x, w, b, m, v):
        # Pure-JAX reference matching the PyTorch forward exactly.
        return ((x - m[None, :, None, None])
                * jax.lax.rsqrt(v[None, :, None, None] + eps)
                * w[None, :, None, None]
                + b[None, :, None, None])

    def make_case(k, N, C, H, W):
        kx, km, kv, kw, kb = jax.random.split(k, 5)
        x = jax.random.normal(kx, (N, C, H, W), dtype=jnp.float32)
        w = jnp.ones((C,), jnp.float32) + 0.1 * jax.random.normal(kw, (C,))
        b = 0.1 * jax.random.normal(kb, (C,))
        m = 0.1 * jax.random.normal(km, (C,))
        v = jnp.ones((C,), jnp.float32) + 0.1 * jnp.abs(jax.random.normal(kv, (C,)))
        return x, w, b, m, v

    k1, k2, k3 = jax.random.split(key, 3)

    # 1) Main case: lane-aligned spatial dim (HW = 256).
    x, w, b, m, v = make_case(k1, 2, 4, 16, 16)
    out = jax.block_until_ready(frozen_batch_norm_2d(x, w, b, m, v, eps))
    assert out.shape == x.shape
    assert jnp.allclose(out, ref_fn(x, w, b, m, v), atol=1e-5, rtol=1e-5)

    # 2) Ragged case: HW = 49 (< 128 lanes, masked stores) and R = 36 with a
    #    partial last row block (exercises the edge-masking paths).
    x, w, b, m, v = make_case(k2, 4, 9, 7, 7)
    out = jax.block_until_ready(frozen_batch_norm_2d(x, w, b, m, v, eps))
    assert jnp.allclose(out, ref_fn(x, w, b, m, v), atol=1e-5, rtol=1e-5)

    # 3) Column-tiled path with a ragged lane edge (forced via a tiny budget):
    #    HW = 300 tiled into 256-wide blocks -> partial last column block.
    x, w, b, m, v = make_case(k3, 2, 8, 15, 20)
    out = jax.block_until_ready(
        frozen_batch_norm_2d(x, w, b, m, v, eps, target_tile_bytes=8192))
    assert jnp.allclose(out, ref_fn(x, w, b, m, v), atol=1e-5, rtol=1e-5)

    print("KERNEL_OK")
</pallas_src>

<mosaic_0001>
module attributes {stable_mosaic.version = 11 : i64} {
  func.func @_frozen_bn_kernel(%arg0: i32, %arg1: i32, %arg2: memref<8x1xf32, #tpu.memory_space<vmem>>, %arg3: memref<8x1xf32, #tpu.memory_space<vmem>>, %arg4: memref<8x256xf32, #tpu.memory_space<vmem>>, %arg5: memref<8x256xf32, #tpu.memory_space<vmem>>) attributes {dimension_semantics = [#tpu.dimension_semantics<parallel>, #tpu.dimension_semantics<parallel>], iteration_bounds = array<i64: 1, 1>, scalar_prefetch = 0 : i64, scratch_operands = 0 : i64, tpu.core_type = #tpu.core_type<tc>, window_params = [{transform_indices = @transform_0, window_bounds = array<i64: 8, 1>}, {transform_indices = @transform_1, window_bounds = array<i64: 8, 1>}, {transform_indices = @transform_2, window_bounds = array<i64: 8, 256>}, {transform_indices = @transform_3, window_bounds = array<i64: 8, 256>}]} {
    %c0 = arith.constant 0 : index
    %c0_0 = arith.constant 0 : index
    %0 = vector.load %arg4[%c0, %c0_0] : memref<8x256xf32, #tpu.memory_space<vmem>>, vector<8x256xf32>
    %c0_1 = arith.constant 0 : index
    %c0_2 = arith.constant 0 : index
    %1 = vector.load %arg2[%c0_1, %c0_2] : memref<8x1xf32, #tpu.memory_space<vmem>>, vector<8x1xf32>
    %2 = vector.broadcast %1 : vector<8x1xf32> to vector<8x256xf32>
    %3 = arith.mulf %0, %2 : vector<8x256xf32>
    %c0_3 = arith.constant 0 : index
    %c0_4 = arith.constant 0 : index
    %4 = vector.load %arg3[%c0_3, %c0_4] : memref<8x1xf32, #tpu.memory_space<vmem>>, vector<8x1xf32>
    %5 = vector.broadcast %4 : vector<8x1xf32> to vector<8x256xf32>
    %6 = arith.addf %3, %5 : vector<8x256xf32>
    %c0_5 = arith.constant 0 : index
    %c0_6 = arith.constant 0 : index
    %7 = vector.load %arg5[%c0_5, %c0_6] : memref<8x256xf32, #tpu.memory_space<vmem>>, vector<8x256xf32>
    tpu.vector_store %arg5[%c0_5, %c0_6], %6 {strides = array<i32>} : memref<8x256xf32, #tpu.memory_space<vmem>>, vector<8x256xf32>,
    return
  }
  func.func @transform_0(%arg0: i32, %arg1: i32) -> (i32, i32) {
    %c0_i32 = arith.constant 0 : i32
    %c0_i32_0 = arith.constant 0 : i32
    return %arg0, %c0_i32 : i32, i32
  }
  func.func @transform_1(%arg0: i32, %arg1: i32) -> (i32, i32) {
    %c0_i32 = arith.constant 0 : i32
    %c0_i32_0 = arith.constant 0 : i32
    return %arg0, %c0_i32 : i32, i32
  }
  func.func @transform_2(%arg0: i32, %arg1: i32) -> (i32, i32) {
    %c0_i32 = arith.constant 0 : i32
    return %arg0, %arg1 : i32, i32
  }
  func.func @transform_3(%arg0: i32, %arg1: i32) -> (i32, i32) {
    %c0_i32 = arith.constant 0 : i32
    return %arg0, %arg1 : i32, i32
  }
}

</mosaic_0001>

<bundles_post_ra>
// kernel: tpu_custom_call.1
= control target key start
LH: loop header
LB: loop body
LE: loop exit
PB: predicated region body
PF: predicated region fallthrough
CT: control target
= control target key end

     0   :  { %s122_s0 = inlined_call_operand.vmem [shape: f32[8,1], index: 0, kind: input, shape index: {}]   ;;  %s123_s1 = inlined_call_operand.vmem [shape: f32[8,1], index: 1, kind: input, shape index: {}]   ;;  %s124_s2 = inlined_call_operand.vmem [shape: f32[8,256], index: 2, kind: input, shape index: {}]   ;;  %s125_s3 = inlined_call_operand.hbm [shape: f32[8,256], index: 3, kind: output, shape index: {}]  }
   0x1   :  { %v17_v0 = vld [vmem:[%s122_s0] sm:$0xff] }
   0x2   :  { %8 = vsyncpa [#allocation3], 0  ;;  %v76_v1 = vmov 0   ;;  %v25_v2 = vld [vmem:[%s123_s1] sm:$0xff]  ;;  %v16_v5 = vld [vmem:[%s124_s2 + $0x8] sm:$0xff]  ;;  %s77_s20 = smov [#allocation2]  }
   0x3   :  { %51 = vset.pattern.permute.xlu0 %v76_v1  ;;  %v15_v4 = vld [vmem:[%s124_s2] sm:$0xff]  ;;  %s41_s0 = sshll.u32 %s77_s20, 4  ;;  %s42_s0 = int_to_ptr.vmem [resolvable:$true] %s41_s0 }
   0x4   :  { %20 = vperm.xlu0 %51, %v17_v0   ;;  %s52_s1 = scalar_lea.vmem %s42_s0, 256  ;;  %p57_p1 = scmp.lt.s32.totalorder %s42_s0, %s42_s0 }
   0x5   :  { %p53_p0 = scmp.ne.s32.totalorder %s42_s0, %s52_s1  ;;  %p58_p2 = scmp.lt.s32.totalorder %s52_s1, %s52_s1 }
   0x7   :  { %p59_p3 = por %p58_p2, %p57_p1 }
   0x8   :  { %28 = vperm.xlu0 %51, %v25_v2  }
   0x9   :  { %p60_p4 = pnand %p59_p3, %p53_p0 }
  0x83   :  { %v21_v3 = vpop.permute.xlu0 %20 }
  0x84   :  { %v23_v6 = vmul.f32 %v21_v3, %v15_v4  ;;  %v24_v7 = vmul.f32 %v21_v3, %v16_v5 }
  0x87   :  { %v29_v8 = vpop.permute.xlu0 %28 }
  0x88   :  { %v31_v9 = vadd.f32 %v29_v8, %v23_v6  ;;  %v32_v10 = vadd.f32 %v29_v8, %v24_v7 }
  0x8a   :  { %33 = vst [vmem:[#allocation2] sm:$0xff] %v31_v9  ;;  %34 = vst [vmem:[#allocation2 + $0x8] sm:$0xff] %v32_v10 }
  0x8b   :  { %63 = shalt.err (!%p60_p4)
}
  0x8c   :  { %s64_s2 = scalar_lea.hbm %s125_s3, 256 }
  0x8d   :  { %p65_p5 = scmp.ne.s32.totalorder %s125_s3, %s64_s2  ;;  %p68_p6 = scmp.lt.u32.totalorder %s64_s2, %s125_s3 }
  0x8f   :  { %p70_p7 = pnand %p68_p6, %p65_p5 }
  0x91   :  { %73 = shalt.err (!%p70_p7)
}
  0x92   :  { %44 = dma.vmem_to_hbm [thread:$0]  %s42_s0, 256, %s125_s3, [#allocation3]  }
  0x93   :  { %74 = dma.done.wait [#allocation3], 256  }
  0x94   :  { %75 = vsyncadd [#allocation3], 4294967040 }
  0x95   :  { %48 = vsyncpa [#allocation3], 1 }

</bundles_post_ra>
